<compile_context>
chip_gen: v7x
topology: tpu7x:2x2x1
jax: 0.10.0
libtpu: 0.0.40
codegen_flags: <defaults>
</compile_context>

<pallas_src>
import jax
import jax.numpy as jnp
from jax import lax
from jax.experimental import pallas as pl
from jax.experimental.pallas import tpu as pltpu


def _round_up(x, m):
    return ((x + m - 1) // m) * m


def simple_score_kernel(idx_ref, ent_ref, rel_ref, out_ref):
    """Scores one (1, block_n) tile of triples.

    idx_ref: (3, block_n) int32  -- rows: head / tail / rela indices.
    ent_ref: (2D, n_ent_pad) bf16 -- row v of source table = [head_embed[v] | tail_embed[v]],
                                     transposed; VMEM resident across the grid.
    rel_ref: (2D, n_rel_pad) bf16 -- row v of source table = [rela_embed[v] | rela_inv_embed[v]].
    out_ref: (1, block_n) f32     -- scores, triples on the lane axis (unmasked stores).
    """
    block_n = out_ref.shape[1]
    two_d = ent_ref.shape[0]
    d = two_d // 2
    n_ent_pad = ent_ref.shape[1]
    n_rel_pad = rel_ref.shape[1]

    h = idx_ref[0:1, :]          # (1, block_n)
    t = idx_ref[1:2, :]
    r = idx_ref[2:3, :]

    # --- fused entity gather: one MXU matmul for BOTH head and tail gathers ---
    ht = jnp.concatenate([h, t], axis=1)                                   # (1, 2*block_n)
    ent_iota = lax.broadcasted_iota(jnp.int32, (n_ent_pad, 2 * block_n), 0)
    # bool -> f32 -> bf16 (exact for one-hot values; two-step cast is always lowerable)
    oh_ht = (ent_iota == ht).astype(jnp.float32).astype(jnp.bfloat16)      # (n_ent_pad, 2*block_n)
    g_ht = jnp.dot(ent_ref[...], oh_ht,
                   preferred_element_type=jnp.float32)                     # (2D, 2*block_n) f32

    g_h = g_ht[:, :block_n]       # column per head h:  rows [0:D)=he,  [D:2D)=hi
    g_t = g_ht[:, block_n:]       # column per tail t:  rows [0:D)=ti,  [D:2D)=te

    # --- relation gather ---
    rel_iota = lax.broadcasted_iota(jnp.int32, (n_rel_pad, block_n), 0)
    oh_r = (rel_iota == r).astype(jnp.float32).astype(jnp.bfloat16)        # (n_rel_pad, block_n)
    g_r = jnp.dot(rel_ref[...], oh_r,
                  preferred_element_type=jnp.float32)                      # (2D, block_n): [re | ri]

    # score = sum_D he*re*te + sum_D hi*ri*ti.
    # Half-swap of g_t done via free sublane slices (d is a multiple of 8).
    p = g_h * g_r                                                          # [he*re | hi*ri]
    fwd = jnp.sum(p[:d] * g_t[d:], axis=0, keepdims=True)                  # (1, block_n)
    inv = jnp.sum(p[d:] * g_t[:d], axis=0, keepdims=True)
    out_ref[...] = (fwd + inv).astype(out_ref.dtype)


def prepare_simple_tables(params, *, table_dtype=jnp.bfloat16):
    """One-time (per-params / model-init) table prep, hoisted out of the forward.

    Builds two role tables of width 2D, padded along the vocab axis to a
    multiple of 128 and transposed so gathered activations are lane-dense.
    """
    head_embed = params["head_embed"]
    tail_embed = params["tail_embed"]
    rela_embed = params["rela_embed"]
    rela_inv_embed = params["rela_inv_embed"]
    n_ent, d = head_embed.shape
    n_rel = rela_embed.shape[0]

    ent = jnp.concatenate([head_embed, tail_embed], axis=1).astype(table_dtype)       # (n_ent, 2D)
    rel = jnp.concatenate([rela_embed, rela_inv_embed], axis=1).astype(table_dtype)   # (n_rel, 2D)

    n_ent_pad = _round_up(n_ent, 128)
    n_rel_pad = _round_up(n_rel, 128)
    ent_t = jnp.pad(ent, ((0, n_ent_pad - n_ent), (0, 0))).T   # (2D, n_ent_pad)
    rel_t = jnp.pad(rel, ((0, n_rel_pad - n_rel), (0, 0))).T   # (2D, n_rel_pad)
    return {"ent_t": ent_t, "rel_t": rel_t, "n_ent": n_ent, "n_rel": n_rel, "dim": d}


def _vmem_budget_bytes():
    """~75% of physical VMEM: ~96 MiB on v5e/v6e (128 MiB), ~48 MiB on v7x (64 MiB)."""
    try:
        cap = int(pltpu.get_tpu_info().vmem_capacity_bytes)
    except Exception:
        cap = 64 << 20
    return (cap * 3) // 4


def _pick_block_n(n, n_ent_pad, n_rel_pad, two_d, table_bytes, budget, max_block_n):
    def temp_bytes(bn):
        onehot = (n_ent_pad * 2 * bn + n_rel_pad * bn) * 6   # int32 iota + bf16 one-hot
        gathered = two_d * 3 * bn * 4                        # g_ht + g_r in f32
        io = (3 + 1) * bn * 4 * 2                            # idx + out tiles (double-buffered)
        return onehot + gathered + io

    bn = max(128, min(max_block_n, _round_up(max(n, 1), 128)))
    # 2*table_bytes: assume the pipeliner may double-buffer the resident tables.
    while bn > 128 and 2 * table_bytes + temp_bytes(bn) > budget:
        bn = max(128, ((bn // 2) // 128) * 128)
    if 2 * table_bytes + temp_bytes(bn) > budget:
        # TODO(synk): scalar-prefetch-driven DMA row gather (tables kept at
        # memory_space=pl.ANY in HBM, double-buffered make_async_copy of the
        # 3 rows per triple) for vocabularies too large to keep VMEM-resident.
        raise NotImplementedError(
            "SimplE vocabulary too large for the VMEM-resident one-hot gather "
            "path on this TPU; DMA row-gather fallback not implemented.")
    return bn


def simple_forward(tables, head, tail, rela, *, max_block_n=1024):
    """JAX wrapper reproducing SimplEModule.forward semantics."""
    shapes = head.shape
    h = head.reshape(-1).astype(jnp.int32)
    t = tail.reshape(-1).astype(jnp.int32)
    r = rela.reshape(-1).astype(jnp.int32)
    n = h.shape[0]

    ent_t, rel_t = tables["ent_t"], tables["rel_t"]
    two_d, n_ent_pad = ent_t.shape
    n_rel_pad = rel_t.shape[1]

    budget = _vmem_budget_bytes()
    table_bytes = (n_ent_pad + n_rel_pad) * two_d * jnp.dtype(ent_t.dtype).itemsize
    block_n = _pick_block_n(n, n_ent_pad, n_rel_pad, two_d, table_bytes, budget, max_block_n)

    np_ = _round_up(max(n, 1), block_n)
    # Only the tiny int32 index array is padded; padded triples point at row 0
    # and are sliced off afterwards.  (Out-of-range indices would score 0.0.)
    idx = jnp.stack([h, t, r], axis=0)
    idx = jnp.pad(idx, ((0, 0), (0, np_ - n)))               # (3, np_)

    def build_call(single_buffer_tables):
        table_kwargs = {"pipeline_mode": pl.Buffered(1)} if single_buffer_tables else {}
        grid_spec = pltpu.PrefetchScalarGridSpec(
            num_scalar_prefetch=0,
            grid=(np_ // block_n,),
            in_specs=[
                pl.BlockSpec((3, block_n), lambda i: (0, i)),
                pl.BlockSpec((two_d, n_ent_pad), lambda i: (0, 0), **table_kwargs),
                pl.BlockSpec((two_d, n_rel_pad), lambda i: (0, 0), **table_kwargs),
            ],
            out_specs=pl.BlockSpec((1, block_n), lambda i: (0, i)),
        )
        return pl.pallas_call(
            simple_score_kernel,
            out_shape=jax.ShapeDtypeStruct((1, np_), jnp.float32),
            grid_spec=grid_spec,
            compiler_params=pltpu.CompilerParams(
                dimension_semantics=("parallel",),
                vmem_limit_bytes=int(budget),
            ),
        )

    try:
        # Preferred: resident tables single-buffered (matters most on v7x's 64 MiB VMEM).
        out = build_call(True)(idx, ent_t, rel_t)
        out = jax.block_until_ready(out)
    except Exception:
        # Fallback to the known-good default-buffered path if Buffered(1) is rejected.
        out = build_call(False)(idx, ent_t, rel_t)

    return out[0, :n].reshape(shapes)


def simple_forward_ref(params, head, tail, rela):
    """Pure-JAX reference mirroring the PyTorch forward (exact f32 gathers)."""
    shapes = head.shape
    h = head.reshape(-1)
    t = tail.reshape(-1)
    r = rela.reshape(-1)
    he = params["head_embed"][h]
    te = params["tail_embed"][t]
    re = params["rela_embed"][r]
    hi = params["tail_embed"][h]
    ti = params["head_embed"][t]
    ri = params["rela_inv_embed"][r]
    s = jnp.sum(he * re * te, axis=-1) + jnp.sum(hi * ri * ti, axis=-1)
    return s.reshape(shapes)


def xavier_uniform(key, shape, dtype=jnp.float32):
    fan_in, fan_out = shape[0], shape[1]
    bound = jnp.sqrt(6.0 / (fan_in + fan_out))
    return jax.random.uniform(key, shape, dtype=dtype, minval=-bound, maxval=bound)


if __name__ == "__main__":
    # Small synthetic config (mirrors SimplEModule.__init__ shapes).
    n_ent, n_rel, hidden_dim = 50, 12, 32
    B, S = 2, 8  # index tensors of shape (B, S)

    key = jax.random.PRNGKey(0)
    k_he, k_te, k_re, k_ri, k_h, k_t, k_r = jax.random.split(key, 7)

    params = {
        "head_embed": xavier_uniform(k_he, (n_ent, hidden_dim)),
        "tail_embed": xavier_uniform(k_te, (n_ent, hidden_dim)),
        "rela_embed": xavier_uniform(k_re, (n_rel, hidden_dim)),
        "rela_inv_embed": xavier_uniform(k_ri, (n_rel, hidden_dim)),
    }
    # Snap params to bf16-representable values so the bf16 table path compares
    # exactly against the f32 gather reference (kernel gathers are exact copies).
    params = {k: v.astype(jnp.bfloat16).astype(jnp.float32) for k, v in params.items()}

    # One-time table prep (== model init); hoisted out of the per-call forward.
    tables = prepare_simple_tables(params, table_dtype=jnp.bfloat16)

    head = jax.random.randint(k_h, (B, S), 0, n_ent, dtype=jnp.int32)
    tail = jax.random.randint(k_t, (B, S), 0, n_ent, dtype=jnp.int32)
    rela = jax.random.randint(k_r, (B, S), 0, n_rel, dtype=jnp.int32)

    score = simple_forward(tables, head, tail, rela)
    score = jax.block_until_ready(score)

    ref = simple_forward_ref(params, head, tail, rela)
    assert score.shape == head.shape, (score.shape, head.shape)
    assert jnp.allclose(score, ref, atol=1e-5, rtol=1e-4), "mismatch vs reference"

    print("KERNEL_OK")
</pallas_src>

<mosaic_0001>
module attributes {stable_mosaic.version = 11 : i64} {
  func.func @simple_score_kernel(%arg0: i32, %arg1: memref<3x128xi32, #tpu.memory_space<vmem>>, %arg2: memref<64x128xbf16, #tpu.memory_space<vmem>>, %arg3: memref<64x128xbf16, #tpu.memory_space<vmem>>, %arg4: memref<1x128xf32, #tpu.memory_space<vmem>>) attributes {dimension_semantics = [#tpu.dimension_semantics<parallel>], iteration_bounds = array<i64: 1>, scalar_prefetch = 0 : i64, scratch_operands = 0 : i64, tpu.core_type = #tpu.core_type<tc>, window_params = [{transform_indices = @transform_0, window_bounds = array<i64: 3, 128>}, {pipeline_mode = #tpu.pipeline_mode<synchronous>, transform_indices = @transform_1, window_bounds = array<i64: 64, 128>}, {pipeline_mode = #tpu.pipeline_mode<synchronous>, transform_indices = @transform_2, window_bounds = array<i64: 64, 128>}, {transform_indices = @transform_3, window_bounds = array<i64: 1, 128>}]} {
    %c0 = arith.constant 0 : index
    %c0_0 = arith.constant 0 : index
    %0 = vector.load %arg1[%c0, %c0_0] : memref<3x128xi32, #tpu.memory_space<vmem>>, vector<1x128xi32>
    %c1 = arith.constant 1 : index
    %c0_1 = arith.constant 0 : index
    %1 = vector.load %arg1[%c1, %c0_1] : memref<3x128xi32, #tpu.memory_space<vmem>>, vector<1x128xi32>
    %c2 = arith.constant 2 : index
    %c0_2 = arith.constant 0 : index
    %2 = vector.load %arg1[%c2, %c0_2] : memref<3x128xi32, #tpu.memory_space<vmem>>, vector<1x128xi32>
    %3 = tpu.concatenate %0, %1 in 1 : vector<1x128xi32>, vector<1x128xi32> -> vector<1x256xi32>
    %4 = tpu.iota {dimensions = array<i32: 0>} : vector<128x256xi32>
    %5 = vector.broadcast %3 : vector<1x256xi32> to vector<128x256xi32>
    %6 = arith.cmpi eq, %4, %5 : vector<128x256xi32>
    %7 = arith.extui %6 : vector<128x256xi1> to vector<128x256xi32>
    %8 = arith.sitofp %7 : vector<128x256xi32> to vector<128x256xf32>
    %9 = arith.truncf %8 : vector<128x256xf32> to vector<128x256xbf16>
    %c0_3 = arith.constant 0 : index
    %c0_4 = arith.constant 0 : index
    %10 = vector.load %arg2[%c0_3, %c0_4] : memref<64x128xbf16, #tpu.memory_space<vmem>>, vector<64x128xbf16>
    %cst = arith.constant dense<0.000000e+00> : vector<64x256xf32>
    %11 = tpu.matmul %10, %9, %cst {dimension_numbers = #tpu.dot_dimension_numbers<[1], [0], [0], [1], [0, 0, 1, 1], [], []>} : vector<64x128xbf16>, vector<128x256xbf16>, vector<64x256xf32> -> vector<64x256xf32>
    %12 = vector.extract_strided_slice %11 {offsets = [0, 0], sizes = [64, 128], strides = [1, 1]} : vector<64x256xf32> to vector<64x128xf32>
    %13 = vector.extract_strided_slice %11 {offsets = [0, 128], sizes = [64, 128], strides = [1, 1]} : vector<64x256xf32> to vector<64x128xf32>
    %14 = tpu.iota {dimensions = array<i32: 0>} : vector<128x128xi32>
    %15 = vector.broadcast %2 : vector<1x128xi32> to vector<128x128xi32>
    %16 = arith.cmpi eq, %14, %15 : vector<128x128xi32>
    %17 = arith.extui %16 : vector<128x128xi1> to vector<128x128xi32>
    %18 = arith.sitofp %17 : vector<128x128xi32> to vector<128x128xf32>
    %19 = arith.truncf %18 : vector<128x128xf32> to vector<128x128xbf16>
    %c0_5 = arith.constant 0 : index
    %c0_6 = arith.constant 0 : index
    %20 = vector.load %arg3[%c0_5, %c0_6] : memref<64x128xbf16, #tpu.memory_space<vmem>>, vector<64x128xbf16>
    %cst_7 = arith.constant dense<0.000000e+00> : vector<64x128xf32>
    %21 = tpu.matmul %20, %19, %cst_7 {dimension_numbers = #tpu.dot_dimension_numbers<[1], [0], [0], [1], [0, 0, 1, 1], [], []>} : vector<64x128xbf16>, vector<128x128xbf16>, vector<64x128xf32> -> vector<64x128xf32>
    %22 = arith.mulf %12, %21 : vector<64x128xf32>
    %23 = vector.extract_strided_slice %22 {offsets = [0, 0], sizes = [32, 128], strides = [1, 1]} : vector<64x128xf32> to vector<32x128xf32>
    %24 = vector.extract_strided_slice %13 {offsets = [32, 0], sizes = [32, 128], strides = [1, 1]} : vector<64x128xf32> to vector<32x128xf32>
    %25 = arith.mulf %23, %24 : vector<32x128xf32>
    %cst_8 = arith.constant dense<0.000000e+00> : vector<128xf32>
    %26 = vector.multi_reduction <add>, %25, %cst_8 [0] : vector<32x128xf32> to vector<128xf32>
    %27 = vector.shape_cast %26 : vector<128xf32> to vector<1x128xf32>
    %28 = vector.extract_strided_slice %22 {offsets = [32, 0], sizes = [32, 128], strides = [1, 1]} : vector<64x128xf32> to vector<32x128xf32>
    %29 = vector.extract_strided_slice %13 {offsets = [0, 0], sizes = [32, 128], strides = [1, 1]} : vector<64x128xf32> to vector<32x128xf32>
    %30 = arith.mulf %28, %29 : vector<32x128xf32>
    %cst_9 = arith.constant dense<0.000000e+00> : vector<128xf32>
    %31 = vector.multi_reduction <add>, %30, %cst_9 [0] : vector<32x128xf32> to vector<128xf32>
    %32 = vector.shape_cast %31 : vector<128xf32> to vector<1x128xf32>
    %33 = arith.addf %27, %32 : vector<1x128xf32>
    %c0_10 = arith.constant 0 : index
    %c0_11 = arith.constant 0 : index
    %34 = vector.load %arg4[%c0_10, %c0_11] : memref<1x128xf32, #tpu.memory_space<vmem>>, vector<1x128xf32>
    tpu.vector_store %arg4[%c0_10, %c0_11], %33 {strides = array<i32>} : memref<1x128xf32, #tpu.memory_space<vmem>>, vector<1x128xf32>,
    return
  }
  func.func @transform_0(%arg0: i32) -> (i32, i32) {
    %c0_i32 = arith.constant 0 : i32
    %c0_i32_0 = arith.constant 0 : i32
    return %c0_i32, %arg0 : i32, i32
  }
  func.func @transform_1(%arg0: i32) -> (i32, i32) {
    %c0_i32 = arith.constant 0 : i32
    %c0_i32_0 = arith.constant 0 : i32
    %c0_i32_1 = arith.constant 0 : i32
    return %c0_i32, %c0_i32_0 : i32, i32
  }
  func.func @transform_2(%arg0: i32) -> (i32, i32) {
    %c0_i32 = arith.constant 0 : i32
    %c0_i32_0 = arith.constant 0 : i32
    %c0_i32_1 = arith.constant 0 : i32
    return %c0_i32, %c0_i32_0 : i32, i32
  }
  func.func @transform_3(%arg0: i32) -> (i32, i32) {
    %c0_i32 = arith.constant 0 : i32
    %c0_i32_0 = arith.constant 0 : i32
    return %c0_i32, %arg0 : i32, i32
  }
}

module attributes {stable_mosaic.version = 11 : i64} {
  func.func @simple_score_kernel(%arg0: i32, %arg1: memref<3x128xi32, #tpu.memory_space<vmem>>, %arg2: memref<64x128xbf16, #tpu.memory_space<vmem>>, %arg3: memref<64x128xbf16, #tpu.memory_space<vmem>>, %arg4: memref<1x128xf32, #tpu.memory_space<vmem>>) attributes {dimension_semantics = [#tpu.dimension_semantics<parallel>], iteration_bounds = array<i64: 1>, scalar_prefetch = 0 : i64, scratch_operands = 0 : i64, tpu.core_type = #tpu.core_type<tc>, window_params = [{transform_indices = @transform_0, window_bounds = array<i64: 3, 128>}, {pipeline_mode = #tpu.pipeline_mode<synchronous>, transform_indices = @transform_1, window_bounds = array<i64: 64, 128>}, {pipeline_mode = #tpu.pipeline_mode<synchronous>, transform_indices = @transform_2, window_bounds = array<i64: 64, 128>}, {transform_indices = @transform_3, window_bounds = array<i64: 1, 128>}]} {
    %c0 = arith.constant 0 : index
    %c0_0 = arith.constant 0 : index
    %0 = vector.load %arg1[%c0, %c0_0] : memref<3x128xi32, #tpu.memory_space<vmem>>, vector<1x128xi32>
    %c1 = arith.constant 1 : index
    %c0_1 = arith.constant 0 : index
    %1 = vector.load %arg1[%c1, %c0_1] : memref<3x128xi32, #tpu.memory_space<vmem>>, vector<1x128xi32>
    %c2 = arith.constant 2 : index
    %c0_2 = arith.constant 0 : index
    %2 = vector.load %arg1[%c2, %c0_2] : memref<3x128xi32, #tpu.memory_space<vmem>>, vector<1x128xi32>
    %3 = tpu.concatenate %0, %1 in 1 : vector<1x128xi32>, vector<1x128xi32> -> vector<1x256xi32>
    %4 = tpu.iota {dimensions = array<i32: 0>} : vector<128x256xi32>
    %5 = vector.broadcast %3 : vector<1x256xi32> to vector<128x256xi32>
    %6 = arith.cmpi eq, %4, %5 : vector<128x256xi32>
    %7 = arith.extui %6 : vector<128x256xi1> to vector<128x256xi32>
    %8 = arith.sitofp %7 : vector<128x256xi32> to vector<128x256xf32>
    %9 = arith.truncf %8 : vector<128x256xf32> to vector<128x256xbf16>
    %c0_3 = arith.constant 0 : index
    %c0_4 = arith.constant 0 : index
    %10 = vector.load %arg2[%c0_3, %c0_4] : memref<64x128xbf16, #tpu.memory_space<vmem>>, vector<64x128xbf16>
    %cst = arith.constant dense<0.000000e+00> : vector<64x256xf32>
    %11 = tpu.matmul %10, %9, %cst {dimension_numbers = #tpu.dot_dimension_numbers<[1], [0], [0], [1], [0, 0, 1, 1], [], []>} : vector<64x128xbf16>, vector<128x256xbf16>, vector<64x256xf32> -> vector<64x256xf32>
    %12 = vector.extract_strided_slice %11 {offsets = [0, 0], sizes = [64, 128], strides = [1, 1]} : vector<64x256xf32> to vector<64x128xf32>
    %13 = vector.extract_strided_slice %11 {offsets = [0, 128], sizes = [64, 128], strides = [1, 1]} : vector<64x256xf32> to vector<64x128xf32>
    %14 = tpu.iota {dimensions = array<i32: 0>} : vector<128x128xi32>
    %15 = vector.broadcast %2 : vector<1x128xi32> to vector<128x128xi32>
    %16 = arith.cmpi eq, %14, %15 : vector<128x128xi32>
    %17 = arith.extui %16 : vector<128x128xi1> to vector<128x128xi32>
    %18 = arith.sitofp %17 : vector<128x128xi32> to vector<128x128xf32>
    %19 = arith.truncf %18 : vector<128x128xf32> to vector<128x128xbf16>
    %c0_5 = arith.constant 0 : index
    %c0_6 = arith.constant 0 : index
    %20 = vector.load %arg3[%c0_5, %c0_6] : memref<64x128xbf16, #tpu.memory_space<vmem>>, vector<64x128xbf16>
    %cst_7 = arith.constant dense<0.000000e+00> : vector<64x128xf32>
    %21 = tpu.matmul %20, %19, %cst_7 {dimension_numbers = #tpu.dot_dimension_numbers<[1], [0], [0], [1], [0, 0, 1, 1], [], []>} : vector<64x128xbf16>, vector<128x128xbf16>, vector<64x128xf32> -> vector<64x128xf32>
    %22 = arith.mulf %12, %21 : vector<64x128xf32>
    %23 = vector.extract_strided_slice %22 {offsets = [0, 0], sizes = [32, 128], strides = [1, 1]} : vector<64x128xf32> to vector<32x128xf32>
    %24 = vector.extract_strided_slice %13 {offsets = [32, 0], sizes = [32, 128], strides = [1, 1]} : vector<64x128xf32> to vector<32x128xf32>
    %25 = arith.mulf %23, %24 : vector<32x128xf32>
    %cst_8 = arith.constant dense<0.000000e+00> : vector<128xf32>
    %26 = vector.multi_reduction <add>, %25, %cst_8 [0] : vector<32x128xf32> to vector<128xf32>
    %27 = vector.shape_cast %26 : vector<128xf32> to vector<1x128xf32>
    %28 = vector.extract_strided_slice %22 {offsets = [32, 0], sizes = [32, 128], strides = [1, 1]} : vector<64x128xf32> to vector<32x128xf32>
    %29 = vector.extract_strided_slice %13 {offsets = [0, 0], sizes = [32, 128], strides = [1, 1]} : vector<64x128xf32> to vector<32x128xf32>
    %30 = arith.mulf %28, %29 : vector<32x128xf32>
    %cst_9 = arith.constant dense<0.000000e+00> : vector<128xf32>
    %31 = vector.multi_reduction <add>, %30, %cst_9 [0] : vector<32x128xf32> to vector<128xf32>
    %32 = vector.shape_cast %31 : vector<128xf32> to vector<1x128xf32>
    %33 = arith.addf %27, %32 : vector<1x128xf32>
    %c0_10 = arith.constant 0 : index
    %c0_11 = arith.constant 0 : index
    %34 = vector.load %arg4[%c0_10, %c0_11] : memref<1x128xf32, #tpu.memory_space<vmem>>, vector<1x128xf32>
    tpu.vector_store %arg4[%c0_10, %c0_11], %33 {strides = array<i32>} : memref<1x128xf32, #tpu.memory_space<vmem>>, vector<1x128xf32>,
    return
  }
  func.func @transform_0(%arg0: i32) -> (i32, i32) {
    %c0_i32 = arith.constant 0 : i32
    %c0_i32_0 = arith.constant 0 : i32
    return %c0_i32, %arg0 : i32, i32
  }
  func.func @transform_1(%arg0: i32) -> (i32, i32) {
    %c0_i32 = arith.constant 0 : i32
    %c0_i32_0 = arith.constant 0 : i32
    %c0_i32_1 = arith.constant 0 : i32
    return %c0_i32, %c0_i32_0 : i32, i32
  }
  func.func @transform_2(%arg0: i32) -> (i32, i32) {
    %c0_i32 = arith.constant 0 : i32
    %c0_i32_0 = arith.constant 0 : i32
    %c0_i32_1 = arith.constant 0 : i32
    return %c0_i32, %c0_i32_0 : i32, i32
  }
  func.func @transform_3(%arg0: i32) -> (i32, i32) {
    %c0_i32 = arith.constant 0 : i32
    %c0_i32_0 = arith.constant 0 : i32
    return %c0_i32, %arg0 : i32, i32
  }
}

</mosaic_0001>

<bundles_post_ra>
// kernel: tpu_custom_call.1
= control target key start
LH: loop header
LB: loop body
LE: loop exit
PB: predicated region body
PF: predicated region fallthrough
CT: control target
= control target key end

     0   :  { %8 = vsyncpa [#allocation3], 0  ;;  %s996_s0 = inlined_call_operand.hbm [shape: s32[3,128], index: 0, kind: input, shape index: {}]   ;;  %s997_s1 = inlined_call_operand.hbm [shape: bf16[64,128], index: 1, kind: input, shape index: {}]   ;;  %s998_s2 = inlined_call_operand.hbm [shape: bf16[64,128], index: 2, kind: input, shape index: {}]   ;;  %s999_s3 = inlined_call_operand.hbm [shape: f32[1,128], index: 3, kind: output, shape index: {}]  }
   0x1   :  { %9 = vsyncpa [#allocation6], 0 }
   0x2   :  { %10 = vsyncpa [#allocation4], 0  ;;  %s762_s12 = smov [#allocation5]   ;;  %s668_s16 = scalar_lea.hbm %s997_s1, 512 }
   0x3   :  { %s26_s13 = sshll.u32 %s762_s12, 4  ;;  %p669_p0 = scmp.ne.s32.totalorder %s997_s1, %s668_s16  ;;  %s27_s13 = int_to_ptr.vmem [resolvable:$true] %s26_s13 }
   0x4   :  { %p672_p1 = scmp.lt.u32.totalorder %s668_s16, %s997_s1 }
   0x6   :  { %p674_p2 = pnand %p672_p1, %p669_p0 }
   0x8   :  { %677 = shalt.err (!%p674_p2)
}
   0x9   :  { %s678_s21 = scalar_lea.vmem %s27_s13, 512  ;;  %p683_p4 = scmp.lt.s32.totalorder %s27_s13, %s27_s13 }
   0xa   :  { %p679_p3 = scmp.ne.s32.totalorder %s27_s13, %s678_s21  ;;  %p684_p5 = scmp.lt.s32.totalorder %s678_s21, %s678_s21 }
   0xc   :  { %p685_p6 = por %p684_p5, %p683_p4 }
   0xe   :  { %p686_p7 = pnand %p685_p6, %p679_p3 }
  0x10   :  { %689 = shalt.err (!%p686_p7)
}
  0x11   :  { %s763_s22 = smov 64   ;;  %s764_s23 = smov 4  }
  0x12   :  { %32 = dma.hbm_to_vmem [thread:$0]  %s997_s1, 512, %s27_s13, [#allocation6], %s763_s22, %s763_s22, %s764_s23  }
  0x13   :  { %s765_s26 = smov [#allocation2]   ;;  %s766_s28 = smov [#allocation7]  }
  0x14   :  { %s17_s27 = sshll.u32 %s765_s26, 4  ;;  %s38_s29 = sshll.u32 %s766_s28, 4  ;;  %s18_s27 = int_to_ptr.vmem [resolvable:$true] %s17_s27  ;;  %s39_s29 = int_to_ptr.vmem [resolvable:$true] %s38_s29 }
  0x15   :  { %s690_s5 = scalar_lea.hbm %s996_s0, 64 }
  0x16   :  { %p691_p8 = scmp.ne.s32.totalorder %s996_s0, %s690_s5  ;;  %p694_p9 = scmp.lt.u32.totalorder %s690_s5, %s996_s0 }
  0x18   :  { %p696_p10 = pnand %p694_p9, %p691_p8 }
  0x1a   :  { %699 = shalt.err (!%p696_p10)
}
  0x1b   :  { %s700_s1 = scalar_lea.vmem %s18_s27, 64  ;;  %p705_p12 = scmp.lt.s32.totalorder %s18_s27, %s18_s27 }
  0x1c   :  { %p701_p11 = scmp.ne.s32.totalorder %s18_s27, %s700_s1  ;;  %p706_p13 = scmp.lt.s32.totalorder %s700_s1, %s700_s1 }
  0x1e   :  { %p707_p0 = por %p706_p13, %p705_p12 }
  0x20   :  { %p708_p1 = pnand %p707_p0, %p701_p11 }
  0x22   :  { %711 = shalt.err (!%p708_p1)
}
  0x23   :  { %20 = dma.hbm_to_vmem [thread:$0]  %s996_s0, 64, %s18_s27, [#allocation3]  }
  0x24   :  { %s712_s14 = scalar_lea.hbm %s998_s2, 512 }
  0x25   :  { %p713_p2 = scmp.ne.s32.totalorder %s998_s2, %s712_s14  ;;  %p716_p3 = scmp.lt.u32.totalorder %s712_s14, %s998_s2 }
  0x27   :  { %p718_p4 = pnand %p716_p3, %p713_p2 }
  0x29   :  { %721 = shalt.err (!%p718_p4)
}
  0x2a   :  { %s722_s19 = scalar_lea.vmem %s39_s29, 512  ;;  %p727_p6 = scmp.lt.s32.totalorder %s39_s29, %s39_s29 }
  0x2b   :  { %p723_p5 = scmp.ne.s32.totalorder %s39_s29, %s722_s19  ;;  %p728_p7 = scmp.lt.s32.totalorder %s722_s19, %s722_s19 }
  0x2d   :  { %p729_p8 = por %p728_p7, %p727_p6 }
  0x2f   :  { %p730_p9 = pnand %p729_p8, %p723_p5 }
  0x31   :  { %733 = shalt.err (!%p730_p9)
}
  0x32   :  { %44 = dma.hbm_to_vmem [thread:$0]  %s998_s2, 512, %s39_s29, [#allocation6], %s763_s22, %s763_s22, %s764_s23  }
  0x33   :  { %756 = dma.done.wait [#allocation3], 64  }
  0x34   :  { %757 = vsyncadd [#allocation3], 4294967232 }
  0x35   :  { %758 = dma.done.wait [#allocation6], 1024  }
  0x36   :  { %759 = vsyncadd [#allocation6], 4294966272  ;;  %v58_v0 = vlaneseq  ;;  %v767_v1 = vmov 0   ;;  %v840_v8 = vld [vmem:[#allocation2 + $0x1] ss:$0 sm:$0xff]  ;;  %v660_v14 = vld [vmem:[#allocation7] sm:$0xff]  }
  0x37   :  { %259 = vmatprep.mubr.bf16.mxu0 %v767_v1  ;;  %v842_v9 = vld [vmem:[#allocation2 + $0x2] ss:$0 sm:$0xff]  ;;  %v844_v10 = vld [vmem:[#allocation2] ss:$0 sm:$0xff]  ;;  %v768_v11 = vmov 1.0|1.0   ;;  %644 = vmatprep.mubr.bf16.mxu1 %v660_v14 }
  0x38   :  { %v833_v2 = vshrl.u32 %v58_v0, 7  ;;  %v661_v27 = vld [vmem:[#allocation5] sm:$0xff]   ;;  %v662_v28 = vld [vmem:[#allocation7 + $0x8] sm:$0xff]   ;;  %v664_v29 = vld [vmem:[#allocation7 + $0x10] sm:$0xff]   ;;  %s769_s2 = smov [#allocation8]  }
  0x39   :  { %v663_v30 = vld [vmem:[#allocation5 + $0x8] sm:$0xff]   ;;  %v665_v31 = vld [vmem:[#allocation7 + $0x18] sm:$0xff]   ;;  %v666_v32 = vld [vmem:[#allocation5 + $0x10] sm:$0xff]   ;;  %s499_s21 = sshll.u32 %s769_s2, 4  ;;  %s500_s21 = int_to_ptr.vmem [resolvable:$true] %s499_s21 }
  0x3a   :  { %v60_v3 = vadd.s32 8, %v833_v2  ;;  %v61_v4 = vadd.s32 16, %v833_v2  ;;  %v62_v5 = vadd.s32 24, %v833_v2  ;;  %v63_v6 = vadd.s32 32, %v833_v2  ;;  %v667_v33 = vld [vmem:[#allocation5 + $0x18] sm:$0xff]   ;;  %s734_s22 = scalar_lea.vmem %s500_s21, 16  ;;  %p739_p11 = scmp.lt.s32.totalorder %s500_s21, %s500_s21 }
  0x3b   :  { %v64_v7 = vadd.s32 40, %v833_v2  ;;  %vm84_vm0 = vcmp.eq.s32.totalorder %v833_v2, %v840_v8  ;;  %vm304_vm2 = vcmp.eq.s32.totalorder %v833_v2, %v842_v9  ;;  %vm83_vm5 = vcmp.eq.s32.totalorder %v833_v2, %v844_v10  ;;  %p735_p10 = scmp.ne.s32.totalorder %s500_s21, %s734_s22  ;;  %s738_s23 = scalar_lea.vmem %s500_s21, 32 }
  0x3c   :  { %vm86_vm1 = vcmp.eq.s32.totalorder %v60_v3, %v840_v8  ;;  %vm305_vm3 = vcmp.eq.s32.totalorder %v60_v3, %v842_v9  ;;  %vm85_vm6 = vcmp.eq.s32.totalorder %v60_v3, %v844_v10  ;;  %vm88_vm7 = vcmp.eq.s32.totalorder %v61_v4, %v840_v8  ;;  %p740_p12 = scmp.lt.s32.totalorder %s738_s23, %s734_s22 }
  0x3d   :  { %vm547_vm4 = vmpackc.low %vm86_vm1, %vm84_vm0  ;;  %vm90_vm8 = vcmp.eq.s32.totalorder %v62_v5, %v840_v8  ;;  %vm306_vm10 = vcmp.eq.s32.totalorder %v61_v4, %v842_v9  ;;  %vm307_vm11 = vcmp.eq.s32.totalorder %v62_v5, %v842_v9  ;;  %vm87_vm13 = vcmp.eq.s32.totalorder %v61_v4, %v844_v10 }
  0x3e   :  { %548 = vmatprep.subr.msk.bf16.mxu0 %vm547_vm4, %v768_v11  ;;  %vm600_vm9 = vmpackc.low %vm305_vm3, %vm304_vm2  ;;  %vm89_vm14 = vcmp.eq.s32.totalorder %v62_v5, %v844_v10  ;;  %v65_v12 = vadd.s32 48, %v833_v2  ;;  %v66_v13 = vadd.s32 56, %v833_v2  ;;  %vm92_vm0 = vcmp.eq.s32.totalorder %v63_v6, %v840_v8  ;;  %p741_p13 = por %p740_p12, %p739_p11 }
  0x3f   :  { %628 = vmatprep.subr.msk.bf16.mxu1 %vm600_vm9, %v768_v11  ;;  %vm549_vm12 = vmpackc.low %vm85_vm6, %vm83_vm5  ;;  %vm94_vm1 = vcmp.eq.s32.totalorder %v64_v7, %v840_v8  ;;  %vm308_vm3 = vcmp.eq.s32.totalorder %v63_v6, %v842_v9  ;;  %vm309_vm4 = vcmp.eq.s32.totalorder %v64_v7, %v842_v9  ;;  %vm91_vm6 = vcmp.eq.s32.totalorder %v63_v6, %v844_v10 }
  0x40   :  { %550 = vmatpush1.bf16.msk.msra.mxu0 %vm549_vm12, %v768_v11  ;;  %629 = vmatpush3.bf16.msk.msra.mxu1 %vm600_vm9, %v768_v11  ;;  %vm551_vm15 = vmpackc.low %vm90_vm8, %vm88_vm7  ;;  %vm93_vm7 = vcmp.eq.s32.totalorder %v64_v7, %v844_v10  ;;  %v67_v15 = vadd.s32 64, %v833_v2  ;;  %v68_v16 = vadd.s32 72, %v833_v2  ;;  %vm96_vm9 = vcmp.eq.s32.totalorder %v65_v12, %v840_v8  ;;  %p742_p0 = pnand %p741_p13, %p735_p10 }
  0x41   :  { %552 = vmatprep.subr.msk.bf16.mxu0 %vm551_vm15, %v768_v11  ;;  %vm602_vm2 = vmpackc.low %vm307_vm11, %vm306_vm10  ;;  %vm98_vm10 = vcmp.eq.s32.totalorder %v66_v13, %v840_v8  ;;  %vm310_vm12 = vcmp.eq.s32.totalorder %v65_v12, %v842_v9  ;;  %vm95_vm15 = vcmp.eq.s32.totalorder %v65_v12, %v844_v10  ;;  %v69_v18 = vadd.s32 80, %v833_v2 }
  0x42   :  { %630 = vmatprep.subr.msk.bf16.mxu1 %vm602_vm2, %v768_v11  ;;  %vm553_vm5 = vmpackc.low %vm89_vm14, %vm87_vm13  ;;  %vm311_vm13 = vcmp.eq.s32.totalorder %v66_v13, %v842_v9  ;;  %v70_v19 = vadd.s32 88, %v833_v2  ;;  %v71_v22 = vadd.s32 96, %v833_v2  ;;  %v72_v23 = vadd.s32 104, %v833_v2 }
  0x43   :  { %vm555_vm8 = vmpackc.low %vm94_vm1, %vm92_vm0  ;;  %vm97_vm0 = vcmp.eq.s32.totalorder %v66_v13, %v844_v10  ;;  %v73_v25 = vadd.s32 112, %v833_v2  ;;  %v74_v26 = vadd.s32 120, %v833_v2 }
  0x44   :  { %554 = vmatpush1.bf16.msk.msra.mxu0 %vm553_vm5, %v768_v11  ;;  %631 = vmatpush3.bf16.msk.msra.mxu1 %vm602_vm2, %v768_v11  ;;  %vm889_vm11 = vmpackc.low %vm309_vm4, %vm308_vm3  ;;  %vm100_vm2 = vcmp.eq.s32.totalorder %v67_v15, %v840_v8  ;;  %vm102_vm3 = vcmp.eq.s32.totalorder %v68_v16, %v840_v8  ;;  %vm312_vm5 = vcmp.eq.s32.totalorder %v67_v15, %v842_v9 }
  0x45   :  { %556 = vmatprep.subr.msk.bf16.mxu0 %vm555_vm8, %v768_v11  ;;  %632 = vmatprep.subr.msk.bf16.mxu1 %vm889_vm11, %v768_v11  ;;  %vm557_vm14 = vmpackc.low %vm93_vm7, %vm91_vm6  ;;  %vm313_vm6 = vcmp.eq.s32.totalorder %v68_v16, %v842_v9 }
  0x46   :  { %vm559_vm1 = vmpackc.low %vm98_vm10, %vm96_vm9  ;;  %vm99_vm9 = vcmp.eq.s32.totalorder %v67_v15, %v844_v10  ;;  %vm101_vm10 = vcmp.eq.s32.totalorder %v68_v16, %v844_v10 }
  0x47   :  { %vm907_vm4 = vmpackc.low %vm311_vm13, %vm310_vm12  ;;  %vm104_vm13 = vcmp.eq.s32.totalorder %v69_v18, %v840_v8 }
  0x48   :  { %558 = vmatpush1.bf16.msk.msra.mxu0 %vm557_vm14, %v768_v11  ;;  %633 = vmatpush3.bf16.msk.msra.mxu1 %vm889_vm11, %v768_v11  ;;  %vm561_vm7 = vmpackc.low %vm97_vm0, %vm95_vm15  ;;  %vm106_vm11 = vcmp.eq.s32.totalorder %v70_v19, %v840_v8  ;;  %vm314_vm14 = vcmp.eq.s32.totalorder %v69_v18, %v842_v9  ;;  %vm315_vm15 = vcmp.eq.s32.totalorder %v70_v19, %v842_v9 }
  0x49   :  { %560 = vmatprep.subr.msk.bf16.mxu0 %vm559_vm1, %v768_v11  ;;  %634 = vmatprep.subr.msk.bf16.mxu1 %vm907_vm4, %v768_v11  ;;  %vm563_vm8 = vmpackc.low %vm102_vm3, %vm100_vm2  ;;  %vm103_vm2 = vcmp.eq.s32.totalorder %v69_v18, %v844_v10  ;;  %vm105_vm3 = vcmp.eq.s32.totalorder %v70_v19, %v844_v10 }
  0x4a   :  { %vm923_vm12 = vmpackc.low %vm313_vm6, %vm312_vm5  ;;  %vm108_vm6 = vcmp.eq.s32.totalorder %v71_v22, %v840_v8 }
  0x4b   :  { %vm565_vm0 = vmpackc.low %vm101_vm10, %vm99_vm9 }
  0x4c   :  { %562 = vmatpush1.bf16.msk.msra.mxu0 %vm561_vm7, %v768_v11  ;;  %635 = vmatpush3.bf16.msk.msra.mxu1 %vm907_vm4, %v768_v11  ;;  %vm567_vm1 = vmpackc.low %vm106_vm11, %vm104_vm13  ;;  %vm110_vm4 = vcmp.eq.s32.totalorder %v72_v23, %v840_v8  ;;  %vm316_vm7 = vcmp.eq.s32.totalorder %v71_v22, %v842_v9  ;;  %vm107_vm13 = vcmp.eq.s32.totalorder %v71_v22, %v844_v10 }
  0x4d   :  { %564 = vmatprep.subr.msk.bf16.mxu0 %vm563_vm8, %v768_v11  ;;  %636 = vmatprep.subr.msk.bf16.mxu1 %vm923_vm12, %v768_v11  ;;  %vm943_vm5 = vmpackc.low %vm315_vm15, %vm314_vm14  ;;  %vm317_vm8 = vcmp.eq.s32.totalorder %v72_v23, %v842_v9  ;;  %vm109_vm11 = vcmp.eq.s32.totalorder %v72_v23, %v844_v10  ;;  %vm112_vm15 = vcmp.eq.s32.totalorder %v73_v25, %v840_v8 }
  0x4e   :  { %vm569_vm9 = vmpackc.low %vm105_vm3, %vm103_vm2  ;;  %vm319_vm2 = vcmp.eq.s32.totalorder %v74_v26, %v842_v9 }
  0x4f   :  { %vm571_vm10 = vmpackc.low %vm110_vm4, %vm108_vm6  ;;  %vm111_vm4 = vcmp.eq.s32.totalorder %v73_v25, %v844_v10 }
  0x50   :  { %566 = vmatpush1.bf16.msk.msra.mxu0 %vm565_vm0, %v768_v11  ;;  %637 = vmatpush3.bf16.msk.msra.mxu1 %vm923_vm12, %v768_v11  ;;  %vm612_vm14 = vmpackc.low %vm317_vm8, %vm316_vm7  ;;  %vm114_vm0 = vcmp.eq.s32.totalorder %v74_v26, %v840_v8  ;;  %vm318_vm12 = vcmp.eq.s32.totalorder %v73_v25, %v842_v9  ;;  %vm113_vm7 = vcmp.eq.s32.totalorder %v74_v26, %v844_v10 }
  0x51   :  { %568 = vmatprep.subr.msk.bf16.mxu0 %vm567_vm1, %v768_v11  ;;  %638 = vmatprep.subr.msk.bf16.mxu1 %vm943_vm5, %v768_v11  ;;  %vm573_vm1 = vmpackc.low %vm109_vm11, %vm107_vm13 }
  0x52   :  { %vm575_vm3 = vmpackc.low %vm114_vm0, %vm112_vm15 }
  0x53   :  { %vm614_vm6 = vmpackc.low %vm319_vm2, %vm318_vm12 }
  0x54   :  { %570 = vmatpush1.bf16.msk.msra.mxu0 %vm569_vm9, %v768_v11  ;;  %639 = vmatpush3.bf16.msk.msra.mxu1 %vm943_vm5, %v768_v11  ;;  %vm577_vm5 = vmpackc.low %vm113_vm7, %vm111_vm4 }
  0x55   :  { %572 = vmatprep.subr.msk.bf16.mxu0 %vm571_vm10, %v768_v11  ;;  %640 = vmatprep.subr.msk.bf16.mxu1 %vm612_vm14, %v768_v11 }
  0x58   :  { %574 = vmatpush1.bf16.msk.msra.mxu0 %vm573_vm1, %v768_v11  ;;  %641 = vmatpush3.bf16.msk.msra.mxu1 %vm612_vm14, %v768_v11 }
  0x59   :  { %576 = vmatprep.subr.msk.bf16.mxu0 %vm575_vm3, %v768_v11  ;;  %642 = vmatprep.subr.msk.bf16.mxu1 %vm614_vm6, %v768_v11 }
  0x5c   :  { %578 = vmatpush1.bf16.msk.msra.mxu0 %vm577_vm5, %v768_v11  ;;  %643 = vmatpush3.bf16.msk.msra.mxu1 %vm614_vm6, %v768_v11 }
  0x5f   :  { %260 = vmatmul.mubr.bf16.vlgmr.msra.gmra.mrb[0].mxu0 %v661_v27  ;;  %645 = vmatmul.mubr.bf16.vlgmr.msra.gmra.mrb[0].mxu1 %v662_v28 }
  0x60   :  { %269 = vmatprep.mubr.bf16.mxu0 %v767_v1  ;;  %648 = vmatprep.mubr.bf16.mxu1 %v664_v29 }
  0x67   :  { %270 = vmatmul.mubr.bf16.gmra.mrb[4].mxu0 %v663_v30  ;;  %649 = vmatmul.mubr.bf16.gmra.mrb[4].mxu1 %v665_v31 }
  0x68   :  { %279 = vmatprep.mubr.bf16.mxu0 %v767_v1 }
  0x6f   :  { %280 = vmatmul.mubr.bf16.gmra.mrb[8].mxu0 %v666_v32 }
  0x70   :  { %289 = vmatprep.mubr.bf16.mxu0 %v767_v1 }
  0x77   :  { %290 = vmatmul.mubr.bf16.gmra.mrb[12].mxu0 %v667_v33 }
 0x132   :  { %v261_v34 = vpop.f32.mrb[0].mxu0  ;;  %v646_v35 = vpop.f32.mrb[0].mxu1 }
 0x133   :  { %v263_v36 = vpop.f32.mrb[1].mxu0  ;;  %v426_v37 = vpop.f32.mrb[1].mxu1 }
 0x134   :  { %v457_v38 = vmul.f32 %v426_v37, %v261_v34  ;;  %v265_v39 = vpop.f32.mrb[2].mxu0  ;;  %v647_v40 = vpop.f32.mrb[2].mxu1 }
 0x135   :  { %v267_v41 = vpop.f32.mrb[3].mxu0  ;;  %v429_v42 = vpop.f32.mrb[3].mxu1 }
 0x136   :  { %v458_v43 = vmul.f32 %v429_v42, %v265_v39 }
 0x13a   :  { %v271_v44 = vpop.f32.mrb[4].mxu0  ;;  %v650_v45 = vpop.f32.mrb[4].mxu1 }
 0x13b   :  { %v459_v46 = vmul.f32 %v646_v35, %v271_v44  ;;  %v273_v47 = vpop.f32.mrb[5].mxu0  ;;  %v442_v48 = vpop.f32.mrb[5].mxu1 }
 0x13c   :  { %v275_v49 = vpop.f32.mrb[6].mxu0  ;;  %v651_v50 = vpop.f32.mrb[6].mxu1 }
 0x13d   :  { %v460_v51 = vmul.f32 %v647_v40, %v275_v49  ;;  %v277_v52 = vpop.f32.mrb[7].mxu0  ;;  %v445_v53 = vpop.f32.mrb[7].mxu1 }
 0x142   :  { %v281_v54 = vpop.f32.mrb[8].mxu0 }
 0x143   :  { %v461_v55 = vmul.f32 %v442_v48, %v281_v54  ;;  %v283_v56 = vpop.f32.mrb[9].mxu0 }
 0x144   :  { %v465_v57 = vmul.f32 %v457_v38, %v283_v56  ;;  %v285_v58 = vpop.f32.mrb[10].mxu0 }
 0x145   :  { %v478_v59 = vmul.f32 %v461_v55, %v263_v36  ;;  %v462_v60 = vmul.f32 %v445_v53, %v285_v58  ;;  %v287_v61 = vpop.f32.mrb[11].mxu0 }
 0x146   :  { %v466_v62 = vmul.f32 %v458_v43, %v287_v61 }
 0x147   :  { %v479_v63 = vmul.f32 %v462_v60, %v267_v41 }
 0x148   :  { %v469_v0 = vadd.f32 %v466_v62, %v465_v57 }
 0x149   :  { %v482_v1 = vadd.f32 %v479_v63, %v478_v59 }
 0x14a   :  { %v291_v2 = vpop.f32.mrb[12].mxu0 }
 0x14b   :  { %v463_v3 = vmul.f32 %v650_v45, %v291_v2  ;;  %v293_v4 = vpop.f32.mrb[13].mxu0 }
 0x14c   :  { %v467_v5 = vmul.f32 %v459_v46, %v293_v4  ;;  %v295_v6 = vpop.f32.mrb[14].mxu0 }
 0x14d   :  { %v480_v7 = vmul.f32 %v463_v3, %v273_v47  ;;  %v464_v8 = vmul.f32 %v651_v50, %v295_v6  ;;  %v297_v9 = vpop.f32.mrb[15].mxu0 }
 0x14e   :  { %v470_v10 = vadd.f32 %v469_v0, %v467_v5  ;;  %v468_v11 = vmul.f32 %v460_v51, %v297_v9 }
 0x14f   :  { %v483_v12 = vadd.f32 %v482_v1, %v480_v7  ;;  %v481_v13 = vmul.f32 %v464_v8, %v277_v52 }
 0x150   :  { %v471_v14 = vadd.f32 %v470_v10, %v468_v11 }
 0x151   :  { %v484_v15 = vadd.f32 %v483_v12, %v481_v13 }
 0x152   :  { %v472_v16 = vrot.slane %v471_v14, 4 }
 0x153   :  { %v485_v17 = vrot.slane %v484_v15, 4 }
 0x154   :  { %v473_v18 = vadd.f32 %v472_v16, %v471_v14 }
 0x155   :  { %v486_v19 = vadd.f32 %v485_v17, %v484_v15 }
 0x156   :  { %v474_v20 = vrot.slane %v473_v18, 2 }
 0x157   :  { %v487_v21 = vrot.slane %v486_v19, 2 }
 0x158   :  { %v475_v22 = vadd.f32 %v474_v20, %v473_v18 }
 0x159   :  { %v488_v23 = vadd.f32 %v487_v21, %v486_v19 }
 0x15a   :  { %v476_v24 = vrot.slane %v475_v22, 1 }
 0x15b   :  { %v489_v25 = vrot.slane %v488_v23, 1 }
 0x15c   :  { %v477_v26 = vadd.f32 %v476_v24, %v475_v22 }
 0x15d   :  { %v490_v27 = vadd.f32 %v489_v25, %v488_v23 }
 0x15f   :  { %v491_v28 = vadd.f32 %v490_v27, %v477_v26 }
 0x161   :  { %492 = vst [vmem:[#allocation8] sm:$0x1] %v491_v28 }
 0x162   :  { %745 = shalt.err (!%p742_p0)
}
 0x163   :  { %s746_s26 = scalar_lea.hbm %s999_s3, 16 }
 0x164   :  { %p747_p1 = scmp.ne.s32.totalorder %s999_s3, %s746_s26  ;;  %p750_p2 = scmp.lt.u32.totalorder %s746_s26, %s999_s3 }
 0x166   :  { %p752_p3 = pnand %p750_p2, %p747_p1 }
 0x168   :  { %755 = shalt.err (!%p752_p3)
}
 0x169   :  { %502 = dma.vmem_to_hbm [thread:$0]  %s500_s21, 16, %s999_s3, [#allocation4]  }
 0x16a   :  { %760 = dma.done.wait [#allocation4], 16  }
 0x16b   :  { %761 = vsyncadd [#allocation4], 4294967280 }
 0x16c   :  { %506 = vsyncpa [#allocation3], 1 }
 0x16d   :  { %507 = vsyncpa [#allocation6], 1 }
 0x16e   :  { %508 = vsyncpa [#allocation4], 1 }

// kernel: tpu_custom_call.1
= control target key start
LH: loop header
LB: loop body
LE: loop exit
PB: predicated region body
PF: predicated region fallthrough
CT: control target
= control target key end

     0   :  { %8 = vsyncpa [#allocation3], 0  ;;  %s996_s0 = inlined_call_operand.hbm [shape: s32[3,128], index: 0, kind: input, shape index: {}]   ;;  %s997_s1 = inlined_call_operand.hbm [shape: bf16[64,128], index: 1, kind: input, shape index: {}]   ;;  %s998_s2 = inlined_call_operand.hbm [shape: bf16[64,128], index: 2, kind: input, shape index: {}]   ;;  %s999_s3 = inlined_call_operand.hbm [shape: f32[1,128], index: 3, kind: output, shape index: {}]  }
   0x1   :  { %9 = vsyncpa [#allocation6], 0 }
   0x2   :  { %10 = vsyncpa [#allocation4], 0  ;;  %s762_s12 = smov [#allocation5]   ;;  %s668_s16 = scalar_lea.hbm %s997_s1, 512 }
   0x3   :  { %s26_s13 = sshll.u32 %s762_s12, 4  ;;  %p669_p0 = scmp.ne.s32.totalorder %s997_s1, %s668_s16  ;;  %s27_s13 = int_to_ptr.vmem [resolvable:$true] %s26_s13 }
   0x4   :  { %p672_p1 = scmp.lt.u32.totalorder %s668_s16, %s997_s1 }
   0x6   :  { %p674_p2 = pnand %p672_p1, %p669_p0 }
   0x8   :  { %677 = shalt.err (!%p674_p2)
}
   0x9   :  { %s678_s21 = scalar_lea.vmem %s27_s13, 512  ;;  %p683_p4 = scmp.lt.s32.totalorder %s27_s13, %s27_s13 }
   0xa   :  { %p679_p3 = scmp.ne.s32.totalorder %s27_s13, %s678_s21  ;;  %p684_p5 = scmp.lt.s32.totalorder %s678_s21, %s678_s21 }
   0xc   :  { %p685_p6 = por %p684_p5, %p683_p4 }
   0xe   :  { %p686_p7 = pnand %p685_p6, %p679_p3 }
  0x10   :  { %689 = shalt.err (!%p686_p7)
}
  0x11   :  { %s763_s22 = smov 64   ;;  %s764_s23 = smov 4  }
  0x12   :  { %32 = dma.hbm_to_vmem [thread:$0]  %s997_s1, 512, %s27_s13, [#allocation6], %s763_s22, %s763_s22, %s764_s23  }
  0x13   :  { %s765_s26 = smov [#allocation2]   ;;  %s766_s28 = smov [#allocation7]  }
  0x14   :  { %s17_s27 = sshll.u32 %s765_s26, 4  ;;  %s38_s29 = sshll.u32 %s766_s28, 4  ;;  %s18_s27 = int_to_ptr.vmem [resolvable:$true] %s17_s27  ;;  %s39_s29 = int_to_ptr.vmem [resolvable:$true] %s38_s29 }
  0x15   :  { %s690_s5 = scalar_lea.hbm %s996_s0, 64 }
  0x16   :  { %p691_p8 = scmp.ne.s32.totalorder %s996_s0, %s690_s5  ;;  %p694_p9 = scmp.lt.u32.totalorder %s690_s5, %s996_s0 }
  0x18   :  { %p696_p10 = pnand %p694_p9, %p691_p8 }
  0x1a   :  { %699 = shalt.err (!%p696_p10)
}
  0x1b   :  { %s700_s1 = scalar_lea.vmem %s18_s27, 64  ;;  %p705_p12 = scmp.lt.s32.totalorder %s18_s27, %s18_s27 }
  0x1c   :  { %p701_p11 = scmp.ne.s32.totalorder %s18_s27, %s700_s1  ;;  %p706_p13 = scmp.lt.s32.totalorder %s700_s1, %s700_s1 }
  0x1e   :  { %p707_p0 = por %p706_p13, %p705_p12 }
  0x20   :  { %p708_p1 = pnand %p707_p0, %p701_p11 }
  0x22   :  { %711 = shalt.err (!%p708_p1)
}
  0x23   :  { %20 = dma.hbm_to_vmem [thread:$0]  %s996_s0, 64, %s18_s27, [#allocation3]  }
  0x24   :  { %s712_s14 = scalar_lea.hbm %s998_s2, 512 }
  0x25   :  { %p713_p2 = scmp.ne.s32.totalorder %s998_s2, %s712_s14  ;;  %p716_p3 = scmp.lt.u32.totalorder %s712_s14, %s998_s2 }
  0x27   :  { %p718_p4 = pnand %p716_p3, %p713_p2 }
  0x29   :  { %721 = shalt.err (!%p718_p4)
}
  0x2a   :  { %s722_s19 = scalar_lea.vmem %s39_s29, 512  ;;  %p727_p6 = scmp.lt.s32.totalorder %s39_s29, %s39_s29 }
  0x2b   :  { %p723_p5 = scmp.ne.s32.totalorder %s39_s29, %s722_s19  ;;  %p728_p7 = scmp.lt.s32.totalorder %s722_s19, %s722_s19 }
  0x2d   :  { %p729_p8 = por %p728_p7, %p727_p6 }
  0x2f   :  { %p730_p9 = pnand %p729_p8, %p723_p5 }
  0x31   :  { %733 = shalt.err (!%p730_p9)
}
  0x32   :  { %44 = dma.hbm_to_vmem [thread:$0]  %s998_s2, 512, %s39_s29, [#allocation6], %s763_s22, %s763_s22, %s764_s23  }
  0x33   :  { %756 = dma.done.wait [#allocation3], 64  }
  0x34   :  { %757 = vsyncadd [#allocation3], 4294967232 }
  0x35   :  { %758 = dma.done.wait [#allocation6], 1024  }
  0x36   :  { %759 = vsyncadd [#allocation6], 4294966272  ;;  %v58_v0 = vlaneseq  ;;  %v767_v1 = vmov 0   ;;  %v840_v8 = vld [vmem:[#allocation2 + $0x1] ss:$0 sm:$0xff]  ;;  %v660_v14 = vld [vmem:[#allocation7] sm:$0xff]  }
  0x37   :  { %259 = vmatprep.mubr.bf16.mxu0 %v767_v1  ;;  %v842_v9 = vld [vmem:[#allocation2 + $0x2] ss:$0 sm:$0xff]  ;;  %v844_v10 = vld [vmem:[#allocation2] ss:$0 sm:$0xff]  ;;  %v768_v11 = vmov 1.0|1.0   ;;  %644 = vmatprep.mubr.bf16.mxu1 %v660_v14 }
  0x38   :  { %v833_v2 = vshrl.u32 %v58_v0, 7  ;;  %v661_v27 = vld [vmem:[#allocation5] sm:$0xff]   ;;  %v662_v28 = vld [vmem:[#allocation7 + $0x8] sm:$0xff]   ;;  %v664_v29 = vld [vmem:[#allocation7 + $0x10] sm:$0xff]   ;;  %s769_s2 = smov [#allocation8]  }
  0x39   :  { %v663_v30 = vld [vmem:[#allocation5 + $0x8] sm:$0xff]   ;;  %v665_v31 = vld [vmem:[#allocation7 + $0x18] sm:$0xff]   ;;  %v666_v32 = vld [vmem:[#allocation5 + $0x10] sm:$0xff]   ;;  %s499_s21 = sshll.u32 %s769_s2, 4  ;;  %s500_s21 = int_to_ptr.vmem [resolvable:$true] %s499_s21 }
  0x3a   :  { %v60_v3 = vadd.s32 8, %v833_v2  ;;  %v61_v4 = vadd.s32 16, %v833_v2  ;;  %v62_v5 = vadd.s32 24, %v833_v2  ;;  %v63_v6 = vadd.s32 32, %v833_v2  ;;  %v667_v33 = vld [vmem:[#allocation5 + $0x18] sm:$0xff]   ;;  %s734_s22 = scalar_lea.vmem %s500_s21, 16  ;;  %p739_p11 = scmp.lt.s32.totalorder %s500_s21, %s500_s21 }
  0x3b   :  { %v64_v7 = vadd.s32 40, %v833_v2  ;;  %vm84_vm0 = vcmp.eq.s32.totalorder %v833_v2, %v840_v8  ;;  %vm304_vm2 = vcmp.eq.s32.totalorder %v833_v2, %v842_v9  ;;  %vm83_vm5 = vcmp.eq.s32.totalorder %v833_v2, %v844_v10  ;;  %p735_p10 = scmp.ne.s32.totalorder %s500_s21, %s734_s22  ;;  %s738_s23 = scalar_lea.vmem %s500_s21, 32 }
  0x3c   :  { %vm86_vm1 = vcmp.eq.s32.totalorder %v60_v3, %v840_v8  ;;  %vm305_vm3 = vcmp.eq.s32.totalorder %v60_v3, %v842_v9  ;;  %vm85_vm6 = vcmp.eq.s32.totalorder %v60_v3, %v844_v10  ;;  %vm88_vm7 = vcmp.eq.s32.totalorder %v61_v4, %v840_v8  ;;  %p740_p12 = scmp.lt.s32.totalorder %s738_s23, %s734_s22 }
  0x3d   :  { %vm547_vm4 = vmpackc.low %vm86_vm1, %vm84_vm0  ;;  %vm90_vm8 = vcmp.eq.s32.totalorder %v62_v5, %v840_v8  ;;  %vm306_vm10 = vcmp.eq.s32.totalorder %v61_v4, %v842_v9  ;;  %vm307_vm11 = vcmp.eq.s32.totalorder %v62_v5, %v842_v9  ;;  %vm87_vm13 = vcmp.eq.s32.totalorder %v61_v4, %v844_v10 }
  0x3e   :  { %548 = vmatprep.subr.msk.bf16.mxu0 %vm547_vm4, %v768_v11  ;;  %vm600_vm9 = vmpackc.low %vm305_vm3, %vm304_vm2  ;;  %vm89_vm14 = vcmp.eq.s32.totalorder %v62_v5, %v844_v10  ;;  %v65_v12 = vadd.s32 48, %v833_v2  ;;  %v66_v13 = vadd.s32 56, %v833_v2  ;;  %vm92_vm0 = vcmp.eq.s32.totalorder %v63_v6, %v840_v8  ;;  %p741_p13 = por %p740_p12, %p739_p11 }
  0x3f   :  { %628 = vmatprep.subr.msk.bf16.mxu1 %vm600_vm9, %v768_v11  ;;  %vm549_vm12 = vmpackc.low %vm85_vm6, %vm83_vm5  ;;  %vm94_vm1 = vcmp.eq.s32.totalorder %v64_v7, %v840_v8  ;;  %vm308_vm3 = vcmp.eq.s32.totalorder %v63_v6, %v842_v9  ;;  %vm309_vm4 = vcmp.eq.s32.totalorder %v64_v7, %v842_v9  ;;  %vm91_vm6 = vcmp.eq.s32.totalorder %v63_v6, %v844_v10 }
  0x40   :  { %550 = vmatpush1.bf16.msk.msra.mxu0 %vm549_vm12, %v768_v11  ;;  %629 = vmatpush3.bf16.msk.msra.mxu1 %vm600_vm9, %v768_v11  ;;  %vm551_vm15 = vmpackc.low %vm90_vm8, %vm88_vm7  ;;  %vm93_vm7 = vcmp.eq.s32.totalorder %v64_v7, %v844_v10  ;;  %v67_v15 = vadd.s32 64, %v833_v2  ;;  %v68_v16 = vadd.s32 72, %v833_v2  ;;  %vm96_vm9 = vcmp.eq.s32.totalorder %v65_v12, %v840_v8  ;;  %p742_p0 = pnand %p741_p13, %p735_p10 }
  0x41   :  { %552 = vmatprep.subr.msk.bf16.mxu0 %vm551_vm15, %v768_v11  ;;  %vm602_vm2 = vmpackc.low %vm307_vm11, %vm306_vm10  ;;  %vm98_vm10 = vcmp.eq.s32.totalorder %v66_v13, %v840_v8  ;;  %vm310_vm12 = vcmp.eq.s32.totalorder %v65_v12, %v842_v9  ;;  %vm95_vm15 = vcmp.eq.s32.totalorder %v65_v12, %v844_v10  ;;  %v69_v18 = vadd.s32 80, %v833_v2 }
  0x42   :  { %630 = vmatprep.subr.msk.bf16.mxu1 %vm602_vm2, %v768_v11  ;;  %vm553_vm5 = vmpackc.low %vm89_vm14, %vm87_vm13  ;;  %vm311_vm13 = vcmp.eq.s32.totalorder %v66_v13, %v842_v9  ;;  %v70_v19 = vadd.s32 88, %v833_v2  ;;  %v71_v22 = vadd.s32 96, %v833_v2  ;;  %v72_v23 = vadd.s32 104, %v833_v2 }
  0x43   :  { %vm555_vm8 = vmpackc.low %vm94_vm1, %vm92_vm0  ;;  %vm97_vm0 = vcmp.eq.s32.totalorder %v66_v13, %v844_v10  ;;  %v73_v25 = vadd.s32 112, %v833_v2  ;;  %v74_v26 = vadd.s32 120, %v833_v2 }
  0x44   :  { %554 = vmatpush1.bf16.msk.msra.mxu0 %vm553_vm5, %v768_v11  ;;  %631 = vmatpush3.bf16.msk.msra.mxu1 %vm602_vm2, %v768_v11  ;;  %vm889_vm11 = vmpackc.low %vm309_vm4, %vm308_vm3  ;;  %vm100_vm2 = vcmp.eq.s32.totalorder %v67_v15, %v840_v8  ;;  %vm102_vm3 = vcmp.eq.s32.totalorder %v68_v16, %v840_v8  ;;  %vm312_vm5 = vcmp.eq.s32.totalorder %v67_v15, %v842_v9 }
  0x45   :  { %556 = vmatprep.subr.msk.bf16.mxu0 %vm555_vm8, %v768_v11  ;;  %632 = vmatprep.subr.msk.bf16.mxu1 %vm889_vm11, %v768_v11  ;;  %vm557_vm14 = vmpackc.low %vm93_vm7, %vm91_vm6  ;;  %vm313_vm6 = vcmp.eq.s32.totalorder %v68_v16, %v842_v9 }
  0x46   :  { %vm559_vm1 = vmpackc.low %vm98_vm10, %vm96_vm9  ;;  %vm99_vm9 = vcmp.eq.s32.totalorder %v67_v15, %v844_v10  ;;  %vm101_vm10 = vcmp.eq.s32.totalorder %v68_v16, %v844_v10 }
  0x47   :  { %vm907_vm4 = vmpackc.low %vm311_vm13, %vm310_vm12  ;;  %vm104_vm13 = vcmp.eq.s32.totalorder %v69_v18, %v840_v8 }
  0x48   :  { %558 = vmatpush1.bf16.msk.msra.mxu0 %vm557_vm14, %v768_v11  ;;  %633 = vmatpush3.bf16.msk.msra.mxu1 %vm889_vm11, %v768_v11  ;;  %vm561_vm7 = vmpackc.low %vm97_vm0, %vm95_vm15  ;;  %vm106_vm11 = vcmp.eq.s32.totalorder %v70_v19, %v840_v8  ;;  %vm314_vm14 = vcmp.eq.s32.totalorder %v69_v18, %v842_v9  ;;  %vm315_vm15 = vcmp.eq.s32.totalorder %v70_v19, %v842_v9 }
  0x49   :  { %560 = vmatprep.subr.msk.bf16.mxu0 %vm559_vm1, %v768_v11  ;;  %634 = vmatprep.subr.msk.bf16.mxu1 %vm907_vm4, %v768_v11  ;;  %vm563_vm8 = vmpackc.low %vm102_vm3, %vm100_vm2  ;;  %vm103_vm2 = vcmp.eq.s32.totalorder %v69_v18, %v844_v10  ;;  %vm105_vm3 = vcmp.eq.s32.totalorder %v70_v19, %v844_v10 }
  0x4a   :  { %vm923_vm12 = vmpackc.low %vm313_vm6, %vm312_vm5  ;;  %vm108_vm6 = vcmp.eq.s32.totalorder %v71_v22, %v840_v8 }
  0x4b   :  { %vm565_vm0 = vmpackc.low %vm101_vm10, %vm99_vm9 }
  0x4c   :  { %562 = vmatpush1.bf16.msk.msra.mxu0 %vm561_vm7, %v768_v11  ;;  %635 = vmatpush3.bf16.msk.msra.mxu1 %vm907_vm4, %v768_v11  ;;  %vm567_vm1 = vmpackc.low %vm106_vm11, %vm104_vm13  ;;  %vm110_vm4 = vcmp.eq.s32.totalorder %v72_v23, %v840_v8  ;;  %vm316_vm7 = vcmp.eq.s32.totalorder %v71_v22, %v842_v9  ;;  %vm107_vm13 = vcmp.eq.s32.totalorder %v71_v22, %v844_v10 }
  0x4d   :  { %564 = vmatprep.subr.msk.bf16.mxu0 %vm563_vm8, %v768_v11  ;;  %636 = vmatprep.subr.msk.bf16.mxu1 %vm923_vm12, %v768_v11  ;;  %vm943_vm5 = vmpackc.low %vm315_vm15, %vm314_vm14  ;;  %vm317_vm8 = vcmp.eq.s32.totalorder %v72_v23, %v842_v9  ;;  %vm109_vm11 = vcmp.eq.s32.totalorder %v72_v23, %v844_v10  ;;  %vm112_vm15 = vcmp.eq.s32.totalorder %v73_v25, %v840_v8 }
  0x4e   :  { %vm569_vm9 = vmpackc.low %vm105_vm3, %vm103_vm2  ;;  %vm319_vm2 = vcmp.eq.s32.totalorder %v74_v26, %v842_v9 }
  0x4f   :  { %vm571_vm10 = vmpackc.low %vm110_vm4, %vm108_vm6  ;;  %vm111_vm4 = vcmp.eq.s32.totalorder %v73_v25, %v844_v10 }
  0x50   :  { %566 = vmatpush1.bf16.msk.msra.mxu0 %vm565_vm0, %v768_v11  ;;  %637 = vmatpush3.bf16.msk.msra.mxu1 %vm923_vm12, %v768_v11  ;;  %vm612_vm14 = vmpackc.low %vm317_vm8, %vm316_vm7  ;;  %vm114_vm0 = vcmp.eq.s32.totalorder %v74_v26, %v840_v8  ;;  %vm318_vm12 = vcmp.eq.s32.totalorder %v73_v25, %v842_v9  ;;  %vm113_vm7 = vcmp.eq.s32.totalorder %v74_v26, %v844_v10 }
  0x51   :  { %568 = vmatprep.subr.msk.bf16.mxu0 %vm567_vm1, %v768_v11  ;;  %638 = vmatprep.subr.msk.bf16.mxu1 %vm943_vm5, %v768_v11  ;;  %vm573_vm1 = vmpackc.low %vm109_vm11, %vm107_vm13 }
  0x52   :  { %vm575_vm3 = vmpackc.low %vm114_vm0, %vm112_vm15 }
  0x53   :  { %vm614_vm6 = vmpackc.low %vm319_vm2, %vm318_vm12 }
  0x54   :  { %570 = vmatpush1.bf16.msk.msra.mxu0 %vm569_vm9, %v768_v11  ;;  %639 = vmatpush3.bf16.msk.msra.mxu1 %vm943_vm5, %v768_v11  ;;  %vm577_vm5 = vmpackc.low %vm113_vm7, %vm111_vm4 }
  0x55   :  { %572 = vmatprep.subr.msk.bf16.mxu0 %vm571_vm10, %v768_v11  ;;  %640 = vmatprep.subr.msk.bf16.mxu1 %vm612_vm14, %v768_v11 }
  0x58   :  { %574 = vmatpush1.bf16.msk.msra.mxu0 %vm573_vm1, %v768_v11  ;;  %641 = vmatpush3.bf16.msk.msra.mxu1 %vm612_vm14, %v768_v11 }
  0x59   :  { %576 = vmatprep.subr.msk.bf16.mxu0 %vm575_vm3, %v768_v11  ;;  %642 = vmatprep.subr.msk.bf16.mxu1 %vm614_vm6, %v768_v11 }
  0x5c   :  { %578 = vmatpush1.bf16.msk.msra.mxu0 %vm577_vm5, %v768_v11  ;;  %643 = vmatpush3.bf16.msk.msra.mxu1 %vm614_vm6, %v768_v11 }
  0x5f   :  { %260 = vmatmul.mubr.bf16.vlgmr.msra.gmra.mrb[0].mxu0 %v661_v27  ;;  %645 = vmatmul.mubr.bf16.vlgmr.msra.gmra.mrb[0].mxu1 %v662_v28 }
  0x60   :  { %269 = vmatprep.mubr.bf16.mxu0 %v767_v1  ;;  %648 = vmatprep.mubr.bf16.mxu1 %v664_v29 }
  0x67   :  { %270 = vmatmul.mubr.bf16.gmra.mrb[4].mxu0 %v663_v30  ;;  %649 = vmatmul.mubr.bf16.gmra.mrb[4].mxu1 %v665_v31 }
  0x68   :  { %279 = vmatprep.mubr.bf16.mxu0 %v767_v1 }
  0x6f   :  { %280 = vmatmul.mubr.bf16.gmra.mrb[8].mxu0 %v666_v32 }
  0x70   :  { %289 = vmatprep.mubr.bf16.mxu0 %v767_v1 }
  0x77   :  { %290 = vmatmul.mubr.bf16.gmra.mrb[12].mxu0 %v667_v33 }
 0x132   :  { %v261_v34 = vpop.f32.mrb[0].mxu0  ;;  %v646_v35 = vpop.f32.mrb[0].mxu1 }
 0x133   :  { %v263_v36 = vpop.f32.mrb[1].mxu0  ;;  %v426_v37 = vpop.f32.mrb[1].mxu1 }
 0x134   :  { %v457_v38 = vmul.f32 %v426_v37, %v261_v34  ;;  %v265_v39 = vpop.f32.mrb[2].mxu0  ;;  %v647_v40 = vpop.f32.mrb[2].mxu1 }
 0x135   :  { %v267_v41 = vpop.f32.mrb[3].mxu0  ;;  %v429_v42 = vpop.f32.mrb[3].mxu1 }
 0x136   :  { %v458_v43 = vmul.f32 %v429_v42, %v265_v39 }
 0x13a   :  { %v271_v44 = vpop.f32.mrb[4].mxu0  ;;  %v650_v45 = vpop.f32.mrb[4].mxu1 }
 0x13b   :  { %v459_v46 = vmul.f32 %v646_v35, %v271_v44  ;;  %v273_v47 = vpop.f32.mrb[5].mxu0  ;;  %v442_v48 = vpop.f32.mrb[5].mxu1 }
 0x13c   :  { %v275_v49 = vpop.f32.mrb[6].mxu0  ;;  %v651_v50 = vpop.f32.mrb[6].mxu1 }
 0x13d   :  { %v460_v51 = vmul.f32 %v647_v40, %v275_v49  ;;  %v277_v52 = vpop.f32.mrb[7].mxu0  ;;  %v445_v53 = vpop.f32.mrb[7].mxu1 }
 0x142   :  { %v281_v54 = vpop.f32.mrb[8].mxu0 }
 0x143   :  { %v461_v55 = vmul.f32 %v442_v48, %v281_v54  ;;  %v283_v56 = vpop.f32.mrb[9].mxu0 }
 0x144   :  { %v465_v57 = vmul.f32 %v457_v38, %v283_v56  ;;  %v285_v58 = vpop.f32.mrb[10].mxu0 }
 0x145   :  { %v478_v59 = vmul.f32 %v461_v55, %v263_v36  ;;  %v462_v60 = vmul.f32 %v445_v53, %v285_v58  ;;  %v287_v61 = vpop.f32.mrb[11].mxu0 }
 0x146   :  { %v466_v62 = vmul.f32 %v458_v43, %v287_v61 }
 0x147   :  { %v479_v63 = vmul.f32 %v462_v60, %v267_v41 }
 0x148   :  { %v469_v0 = vadd.f32 %v466_v62, %v465_v57 }
 0x149   :  { %v482_v1 = vadd.f32 %v479_v63, %v478_v59 }
 0x14a   :  { %v291_v2 = vpop.f32.mrb[12].mxu0 }
 0x14b   :  { %v463_v3 = vmul.f32 %v650_v45, %v291_v2  ;;  %v293_v4 = vpop.f32.mrb[13].mxu0 }
 0x14c   :  { %v467_v5 = vmul.f32 %v459_v46, %v293_v4  ;;  %v295_v6 = vpop.f32.mrb[14].mxu0 }
 0x14d   :  { %v480_v7 = vmul.f32 %v463_v3, %v273_v47  ;;  %v464_v8 = vmul.f32 %v651_v50, %v295_v6  ;;  %v297_v9 = vpop.f32.mrb[15].mxu0 }
 0x14e   :  { %v470_v10 = vadd.f32 %v469_v0, %v467_v5  ;;  %v468_v11 = vmul.f32 %v460_v51, %v297_v9 }
 0x14f   :  { %v483_v12 = vadd.f32 %v482_v1, %v480_v7  ;;  %v481_v13 = vmul.f32 %v464_v8, %v277_v52 }
 0x150   :  { %v471_v14 = vadd.f32 %v470_v10, %v468_v11 }
 0x151   :  { %v484_v15 = vadd.f32 %v483_v12, %v481_v13 }
 0x152   :  { %v472_v16 = vrot.slane %v471_v14, 4 }
 0x153   :  { %v485_v17 = vrot.slane %v484_v15, 4 }
 0x154   :  { %v473_v18 = vadd.f32 %v472_v16, %v471_v14 }
 0x155   :  { %v486_v19 = vadd.f32 %v485_v17, %v484_v15 }
 0x156   :  { %v474_v20 = vrot.slane %v473_v18, 2 }
 0x157   :  { %v487_v21 = vrot.slane %v486_v19, 2 }
 0x158   :  { %v475_v22 = vadd.f32 %v474_v20, %v473_v18 }
 0x159   :  { %v488_v23 = vadd.f32 %v487_v21, %v486_v19 }
 0x15a   :  { %v476_v24 = vrot.slane %v475_v22, 1 }
 0x15b   :  { %v489_v25 = vrot.slane %v488_v23, 1 }
 0x15c   :  { %v477_v26 = vadd.f32 %v476_v24, %v475_v22 }
 0x15d   :  { %v490_v27 = vadd.f32 %v489_v25, %v488_v23 }
 0x15f   :  { %v491_v28 = vadd.f32 %v490_v27, %v477_v26 }
 0x161   :  { %492 = vst [vmem:[#allocation8] sm:$0x1] %v491_v28 }
 0x162   :  { %745 = shalt.err (!%p742_p0)
}
 0x163   :  { %s746_s26 = scalar_lea.hbm %s999_s3, 16 }
 0x164   :  { %p747_p1 = scmp.ne.s32.totalorder %s999_s3, %s746_s26  ;;  %p750_p2 = scmp.lt.u32.totalorder %s746_s26, %s999_s3 }
 0x166   :  { %p752_p3 = pnand %p750_p2, %p747_p1 }
 0x168   :  { %755 = shalt.err (!%p752_p3)
}
 0x169   :  { %502 = dma.vmem_to_hbm [thread:$0]  %s500_s21, 16, %s999_s3, [#allocation4]  }
 0x16a   :  { %760 = dma.done.wait [#allocation4], 16  }
 0x16b   :  { %761 = vsyncadd [#allocation4], 4294967280 }
 0x16c   :  { %506 = vsyncpa [#allocation3], 1 }
 0x16d   :  { %507 = vsyncpa [#allocation6], 1 }
 0x16e   :  { %508 = vsyncpa [#allocation4], 1 }

</bundles_post_ra>
